<compile_context>
chip_gen: v7x
topology: tpu7x:2x2x1
jax: 0.10.0
libtpu: 0.0.40
codegen_flags: <defaults>
</compile_context>

<pallas_src>
import jax
import jax.numpy as jnp
from jax.experimental import pallas as pl
from jax.experimental.pallas import tpu as pltpu


def _round_up(x, m):
    return ((x + m - 1) // m) * m


# ----------------------------------------------------------------------------
# Fused kernel: encoder MLP + fused mu/log_var head + rsample + 4-PL decoder.
# Everything is transposed: batch on lanes.
# ----------------------------------------------------------------------------
def _make_fused_kernel(n_layers):
    """Ref order:
       inputs : y_T, [wT_i, b_i]*n_layers, whead_T, bhead, a, b_item, c_item,
                scale_item, eps_T
       outputs: mu_T, sigma_T, x_T, prob_T
    """

    def kernel(*refs):
        y_ref = refs[0]
        layer_refs = refs[1:1 + 2 * n_layers]
        (whead_ref, bhead_ref, a_ref, bi_ref, ci_ref, sc_ref,
         eps_ref) = refs[1 + 2 * n_layers:8 + 2 * n_layers]
        (mu_ref, sigma_ref, x_ref, prob_ref) = refs[8 + 2 * n_layers:]

        K, TB = mu_ref.shape                 # latent size, batch tile (lanes)
        J = prob_ref.shape[1]                # number of items
        s_chunk = eps_ref.shape[0]           # samples handled per grid step
        s = pl.program_id(1)                 # sample-chunk index (trailing axis)

        # ---- encoder: once per batch tile (sample axis is the trailing
        #      "arbitrary" grid dim, so the mu/sigma output blocks stay
        #      VMEM-resident across it and are read back below). -------------
        @pl.when(s == 0)
        def _encode():
            h = y_ref[...]                                   # (J, TB) bf16
            for i in range(n_layers):
                wT = layer_refs[2 * i][...]                  # (H_out, H_in) bf16
                b = layer_refs[2 * i + 1][...]               # (H_out, 1)  f32
                h = jnp.maximum(
                    jnp.dot(wT, h, preferred_element_type=jnp.float32) + b, 0.0
                ).astype(jnp.bfloat16)                       # cast only at dot boundary
            head = (jnp.dot(whead_ref[...], h,
                            preferred_element_type=jnp.float32)
                    + bhead_ref[...])                        # (2K, TB) f32
            mu_ref[...] = head[:K]
            sigma_ref[...] = jnp.exp(0.5 * head[K:])         # f32 transcendental (EUP)

        # ---- rsample + 4-PL IRT decoder for this chunk of samples -----------
        # TODO(synk): eps could be generated in-kernel with pltpu.prng_random_bits
        # to drop this HBM stream, but that changes the random stream vs the
        # jax.random.normal reference, so it is kept as an input here.
        mu = mu_ref[...]                                     # (K, TB) f32
        sigma = sigma_ref[...]
        a = a_ref[...]                                       # (J, K) bf16
        # Hoist the lane-broadcasts of the per-item columns out of the loop.
        b_bc = jnp.broadcast_to(bi_ref[...], (J, TB))
        c_bc = jnp.broadcast_to(ci_ref[...], (J, TB))
        s_bc = jnp.broadcast_to(sc_ref[...], (J, TB))        # scale = d - c

        for sc in range(s_chunk):
            x = mu + sigma * eps_ref[sc]                     # (K, TB) f32
            x_ref[sc] = x
            logits = jnp.dot(a, x.astype(jnp.bfloat16),
                             preferred_element_type=jnp.float32) + b_bc
            prob_ref[sc] = c_bc + s_bc * jax.nn.sigmoid(logits)

    return kernel


# ----------------------------------------------------------------------------
# Parameter construction (shapes follow the nn.Module)
# ----------------------------------------------------------------------------
def init_mirt_iwvae_params(key, input_size, hidden_size, depth, latent_size, pl_model):
    keys = jax.random.split(key, 16)
    ki = iter(range(16))

    def lin(k, fan_in, fan_out, scale=0.1):
        kw, kb = jax.random.split(k)
        w = jax.random.normal(kw, (fan_in, fan_out), jnp.float32) * scale
        b = jax.random.normal(kb, (fan_out,), jnp.float32) * scale
        return w, b

    layer_params = [lin(keys[next(ki)], input_size, hidden_size)]
    for _ in range(depth):
        layer_params.append(lin(keys[next(ki)], hidden_size, hidden_size))

    wmu, bmu = lin(keys[next(ki)], hidden_size, latent_size)
    wlv, blv = lin(keys[next(ki)], hidden_size, latent_size)

    J, K = input_size, latent_size
    a = jax.random.normal(keys[next(ki)], (J, K), jnp.float32) * 0.1
    b = jax.random.normal(keys[next(ki)], (J,), jnp.float32) * 0.1
    if pl_model > 2:
        unres_c = jax.random.normal(keys[next(ki)], (J,), jnp.float32) * 0.1 - 4.0
        c = jax.nn.sigmoid(unres_c)
    else:
        c = jnp.zeros((J,), jnp.float32)
    if pl_model > 3:
        unres_d = jax.random.normal(keys[next(ki)], (J,), jnp.float32) * 0.1 + 4.0
        d = jax.nn.sigmoid(unres_d)
    else:
        d = jnp.ones((J,), jnp.float32)

    return dict(layers=layer_params, wmu=wmu, bmu=bmu, wlv=wlv, blv=blv,
                a=a, b=b, c=c, d=d)


# ----------------------------------------------------------------------------
# Forward wrapper
# ----------------------------------------------------------------------------
def mirt_iwvae_forward(params, y, eps_key, R=1, S=1, block_cols=None, s_chunk=None):
    """Returns (y_prob:(S,R,B,J), mu:(B,K), sigma:(B,K), x:(S,R,B,K))."""
    y = y.astype(jnp.float32)
    B, J = y.shape
    K = params["wmu"].shape[1]
    SR = S * R
    layers = params["layers"]
    n_layers = len(layers)
    bf = jnp.bfloat16

    # ---- batch tiling: batch lives on the LANE axis -> pad to multiple of 128.
    B_pad = _round_up(B, 128)
    if block_cols is None:
        TB = min(512, B_pad)
        # v7x has 2 TensorCores; make sure the "parallel" batch axis yields at
        # least 2 tiles for mid-sized batches so both cores get work.
        if B_pad >= 256 and B_pad // TB < 2:
            TB = _round_up(pl.cdiv(B_pad, 2), 128)
    else:
        TB = block_cols
    B_pad = _round_up(B_pad, TB)
    n_btiles = B_pad // TB

    # ---- sample-axis chunking: amortize per-grid-step overhead.
    if s_chunk is None:
        s_chunk = max(1, min(8, SR))
    SR_pad = _round_up(SR, s_chunk)
    n_schunks = SR_pad // s_chunk

    # rsample noise: same key/shape as the reference -> bit-exact reproducibility.
    eps = jax.random.normal(eps_key, (S, R, B, K), jnp.float32)
    eps_T = jnp.transpose(eps.reshape(SR, B, K), (0, 2, 1))          # (SR, K, B)
    eps_T = jnp.pad(eps_T, ((0, SR_pad - SR), (0, 0), (0, B_pad - B)))

    y_T = jnp.pad(y.T, ((0, 0), (0, B_pad - B))).astype(bf)          # (J, B_pad)

    inputs = [y_T]
    for (w, b) in layers:
        inputs.append(w.T.astype(bf))                                 # (H_out, H_in)
        inputs.append(b.reshape(-1, 1).astype(jnp.float32))           # (H_out, 1)
    whead = jnp.concatenate([params["wmu"].T, params["wlv"].T], axis=0).astype(bf)
    bhead = jnp.concatenate([params["bmu"], params["blv"]]).reshape(-1, 1)
    scale = (params["d"] - params["c"]).reshape(-1, 1)
    inputs += [
        whead,                                                        # (2K, H) bf16
        bhead.astype(jnp.float32),                                    # (2K, 1)
        params["a"].astype(bf),                                       # (J, K)
        params["b"].reshape(-1, 1).astype(jnp.float32),               # (J, 1)
        params["c"].reshape(-1, 1).astype(jnp.float32),               # (J, 1)
        scale.astype(jnp.float32),                                    # (J, 1)
        eps_T,                                                        # (SR_pad, K, B_pad)
    ]

    # y streams over batch tiles only (reused across the sample axis);
    # weights / item params are resident (constant index_map);
    # eps streams over (sample_chunk, batch_tile).
    in_specs = [pl.BlockSpec((J, TB), lambda b, s: (0, b))]
    for arr in inputs[1:-1]:
        in_specs.append(pl.BlockSpec(arr.shape, lambda b, s: (0, 0)))
    in_specs.append(pl.BlockSpec((s_chunk, K, TB), lambda b, s: (s, 0, b)))

    out_specs = [
        pl.BlockSpec((K, TB), lambda b, s: (0, b)),            # mu^T (written at s==0)
        pl.BlockSpec((K, TB), lambda b, s: (0, b)),            # sigma^T
        pl.BlockSpec((s_chunk, K, TB), lambda b, s: (s, 0, b)),  # x^T
        pl.BlockSpec((s_chunk, J, TB), lambda b, s: (s, 0, b)),  # y_prob^T
    ]

    out_shape = (
        jax.ShapeDtypeStruct((K, B_pad), jnp.float32),
        jax.ShapeDtypeStruct((K, B_pad), jnp.float32),
        jax.ShapeDtypeStruct((SR_pad, K, B_pad), jnp.float32),
        jax.ShapeDtypeStruct((SR_pad, J, B_pad), jnp.float32),
    )

    mu_T, sigma_T, x_T, prob_T = pl.pallas_call(
        _make_fused_kernel(n_layers),
        out_shape=out_shape,
        grid=(n_btiles, n_schunks),
        in_specs=in_specs,
        out_specs=out_specs,
        compiler_params=pltpu.CompilerParams(
            # Sample axis MUST stay the trailing "arbitrary" axis: the encoder
            # runs only at s==0 and mu/sigma are read back from their
            # VMEM-resident output blocks on later sample steps.
            dimension_semantics=("parallel", "arbitrary")),
    )(*inputs)

    mu = mu_T[:, :B].T
    sigma = sigma_T[:, :B].T
    x = jnp.transpose(x_T[:SR, :, :B], (0, 2, 1)).reshape(S, R, B, K)
    y_prob = jnp.transpose(prob_T[:SR, :, :B], (0, 2, 1)).reshape(S, R, B, J)
    # NOTE: torch returns dist.Bernoulli(probs=y_prob), dist.Normal(mu, sigma), x.
    return y_prob, mu, sigma, x


# ----------------------------------------------------------------------------
# References for validation
# ----------------------------------------------------------------------------
def _reference_forward_f32(params, y, eps_key, R, S):
    y = y.astype(jnp.float32)
    h = y
    for (w, b) in params["layers"]:
        h = jnp.maximum(h @ w + b, 0.0)
    mu = h @ params["wmu"] + params["bmu"]
    sigma = jnp.exp(0.5 * (h @ params["wlv"] + params["blv"]))
    B, K = mu.shape
    eps = jax.random.normal(eps_key, (S, R, B, K), jnp.float32)
    x = mu + sigma * eps
    logits = x @ params["a"].T + params["b"]
    y_prob = params["c"] + (params["d"] - params["c"]) * jax.nn.sigmoid(logits)
    return y_prob, mu, sigma, x


def _reference_forward_bf16(params, y, eps_key, R, S):
    """Matches the kernel's numerics: bf16 at matmul boundaries, f32 accumulate."""
    bf = jnp.bfloat16
    h = y.astype(jnp.float32).astype(bf)
    for (w, b) in params["layers"]:
        h = jnp.maximum(
            jnp.dot(h, w.astype(bf), preferred_element_type=jnp.float32) + b, 0.0
        ).astype(bf)
    mu = jnp.dot(h, params["wmu"].astype(bf),
                 preferred_element_type=jnp.float32) + params["bmu"]
    sigma = jnp.exp(0.5 * (jnp.dot(h, params["wlv"].astype(bf),
                                   preferred_element_type=jnp.float32)
                           + params["blv"]))
    B, K = mu.shape
    eps = jax.random.normal(eps_key, (S, R, B, K), jnp.float32)
    x = mu + sigma * eps
    logits = jnp.dot(x.astype(bf), params["a"].T.astype(bf),
                     preferred_element_type=jnp.float32) + params["b"]
    y_prob = params["c"] + (params["d"] - params["c"]) * jax.nn.sigmoid(logits)
    return y_prob, mu, sigma, x


if __name__ == "__main__":
    import numpy as np

    # Small shapes consistent with the module.
    input_size = 16   # J: number of items
    hidden_size = 32
    depth = 2
    latent_size = 8   # K
    pl_model = 4      # 4-PL IRT: c and d parameters active
    batch = 4
    S, R = 2, 3

    key = jax.random.PRNGKey(0)
    k_param, k_data, k_eps = jax.random.split(key, 3)

    params = init_mirt_iwvae_params(
        k_param, input_size, hidden_size, depth, latent_size, pl_model
    )

    # Binary item responses (the IRT input), cast to float in forward.
    y = (jax.random.uniform(k_data, (batch, input_size)) > 0.5).astype(jnp.float32)

    y_prob, mu, sigma, x = mirt_iwvae_forward(params, y, k_eps, R=R, S=S)
    jax.block_until_ready((y_prob, mu, sigma, x))

    # 1) Tight check against a reference using the same bf16-matmul numerics.
    yb, mb, sb, xb = _reference_forward_bf16(params, y, k_eps, R, S)
    np.testing.assert_allclose(np.asarray(mu), np.asarray(mb), rtol=1e-3, atol=1e-3)
    np.testing.assert_allclose(np.asarray(sigma), np.asarray(sb), rtol=1e-3, atol=1e-3)
    np.testing.assert_allclose(np.asarray(x), np.asarray(xb), rtol=1e-3, atol=1e-3)
    np.testing.assert_allclose(np.asarray(y_prob), np.asarray(yb), rtol=1e-3, atol=1e-3)

    # 2) Loose check against the pure-f32 reference (bf16 matmul rounding only).
    yf, mf, sf, xf = _reference_forward_f32(params, y, k_eps, R, S)
    np.testing.assert_allclose(np.asarray(mu), np.asarray(mf), rtol=5e-2, atol=5e-2)
    np.testing.assert_allclose(np.asarray(sigma), np.asarray(sf), rtol=5e-2, atol=5e-2)
    np.testing.assert_allclose(np.asarray(x), np.asarray(xf), rtol=5e-2, atol=5e-2)
    np.testing.assert_allclose(np.asarray(y_prob), np.asarray(yf), rtol=5e-2, atol=5e-2)

    assert y_prob.shape == (S, R, batch, input_size)
    assert x.shape == (S, R, batch, latent_size)
    assert mu.shape == (batch, latent_size) and sigma.shape == (batch, latent_size)

    print("KERNEL_OK")
</pallas_src>

<mosaic_0001>
module attributes {stable_mosaic.version = 11 : i64} {
  func.func @kernel(%arg0: i32, %arg1: i32, %arg2: memref<16x128xbf16, #tpu.memory_space<vmem>>, %arg3: memref<32x16xbf16, #tpu.memory_space<vmem>>, %arg4: memref<32x1xf32, #tpu.memory_space<vmem>>, %arg5: memref<32x32xbf16, #tpu.memory_space<vmem>>, %arg6: memref<32x1xf32, #tpu.memory_space<vmem>>, %arg7: memref<32x32xbf16, #tpu.memory_space<vmem>>, %arg8: memref<32x1xf32, #tpu.memory_space<vmem>>, %arg9: memref<16x32xbf16, #tpu.memory_space<vmem>>, %arg10: memref<16x1xf32, #tpu.memory_space<vmem>>, %arg11: memref<16x8xbf16, #tpu.memory_space<vmem>>, %arg12: memref<16x1xf32, #tpu.memory_space<vmem>>, %arg13: memref<16x1xf32, #tpu.memory_space<vmem>>, %arg14: memref<16x1xf32, #tpu.memory_space<vmem>>, %arg15: memref<6x8x128xf32, #tpu.memory_space<vmem>>, %arg16: memref<8x128xf32, #tpu.memory_space<vmem>>, %arg17: memref<8x128xf32, #tpu.memory_space<vmem>>, %arg18: memref<6x8x128xf32, #tpu.memory_space<vmem>>, %arg19: memref<6x16x128xf32, #tpu.memory_space<vmem>>) attributes {dimension_semantics = [#tpu.dimension_semantics<parallel>, #tpu.dimension_semantics<arbitrary>], iteration_bounds = array<i64: 1, 1>, scalar_prefetch = 0 : i64, scratch_operands = 0 : i64, tpu.core_type = #tpu.core_type<tc>, window_params = [{transform_indices = @transform_0, window_bounds = array<i64: 16, 128>}, {pipeline_mode = #tpu.pipeline_mode<synchronous>, transform_indices = @transform_1, window_bounds = array<i64: 32, 16>}, {pipeline_mode = #tpu.pipeline_mode<synchronous>, transform_indices = @transform_2, window_bounds = array<i64: 32, 1>}, {pipeline_mode = #tpu.pipeline_mode<synchronous>, transform_indices = @transform_3, window_bounds = array<i64: 32, 32>}, {pipeline_mode = #tpu.pipeline_mode<synchronous>, transform_indices = @transform_4, window_bounds = array<i64: 32, 1>}, {pipeline_mode = #tpu.pipeline_mode<synchronous>, transform_indices = @transform_5, window_bounds = array<i64: 32, 32>}, {pipeline_mode = #tpu.pipeline_mode<synchronous>, transform_indices = @transform_6, window_bounds = array<i64: 32, 1>}, {pipeline_mode = #tpu.pipeline_mode<synchronous>, transform_indices = @transform_7, window_bounds = array<i64: 16, 32>}, {pipeline_mode = #tpu.pipeline_mode<synchronous>, transform_indices = @transform_8, window_bounds = array<i64: 16, 1>}, {pipeline_mode = #tpu.pipeline_mode<synchronous>, transform_indices = @transform_9, window_bounds = array<i64: 16, 8>}, {pipeline_mode = #tpu.pipeline_mode<synchronous>, transform_indices = @transform_10, window_bounds = array<i64: 16, 1>}, {pipeline_mode = #tpu.pipeline_mode<synchronous>, transform_indices = @transform_11, window_bounds = array<i64: 16, 1>}, {pipeline_mode = #tpu.pipeline_mode<synchronous>, transform_indices = @transform_12, window_bounds = array<i64: 16, 1>}, {transform_indices = @transform_13, window_bounds = array<i64: 6, 8, 128>}, {transform_indices = @transform_14, window_bounds = array<i64: 8, 128>}, {transform_indices = @transform_15, window_bounds = array<i64: 8, 128>}, {transform_indices = @transform_16, window_bounds = array<i64: 6, 8, 128>}, {transform_indices = @transform_17, window_bounds = array<i64: 6, 16, 128>}]} {
    %c0_i32 = arith.constant 0 : i32
    %0 = arith.cmpi eq, %arg1, %c0_i32 : i32
    %1 = arith.extui %0 : i1 to i32
    %c0_i32_0 = arith.constant 0 : i32
    %2 = arith.cmpi ne, %1, %c0_i32_0 : i32
    scf.if %2 {
      %c0_72 = arith.constant 0 : index
      %c0_73 = arith.constant 0 : index
      %135 = vector.load %arg2[%c0_72, %c0_73] : memref<16x128xbf16, #tpu.memory_space<vmem>>, vector<16x128xbf16>
      %c0_74 = arith.constant 0 : index
      %c0_75 = arith.constant 0 : index
      %136 = vector.load %arg3[%c0_74, %c0_75] : memref<32x16xbf16, #tpu.memory_space<vmem>>, vector<32x16xbf16>
      %c0_76 = arith.constant 0 : index
      %c0_77 = arith.constant 0 : index
      %137 = vector.load %arg4[%c0_76, %c0_77] : memref<32x1xf32, #tpu.memory_space<vmem>>, vector<32x1xf32>
      %cst_78 = arith.constant dense<0.000000e+00> : vector<32x128xf32>
      %138 = tpu.matmul %136, %135, %cst_78 {dimension_numbers = #tpu.dot_dimension_numbers<[1], [0], [0], [1], [0, 0, 1, 1], [], []>} : vector<32x16xbf16>, vector<16x128xbf16>, vector<32x128xf32> -> vector<32x128xf32>
      %139 = vector.broadcast %137 : vector<32x1xf32> to vector<32x128xf32>
      %140 = arith.addf %138, %139 : vector<32x128xf32>
      %cst_79 = arith.constant 0.000000e+00 : f32
      %141 = vector.broadcast %cst_79 : f32 to vector<32x128xf32>
      %142 = arith.maximumf %140, %141 : vector<32x128xf32>
      %143 = arith.truncf %142 : vector<32x128xf32> to vector<32x128xbf16>
      %c0_80 = arith.constant 0 : index
      %c0_81 = arith.constant 0 : index
      %144 = vector.load %arg5[%c0_80, %c0_81] : memref<32x32xbf16, #tpu.memory_space<vmem>>, vector<32x32xbf16>
      %c0_82 = arith.constant 0 : index
      %c0_83 = arith.constant 0 : index
      %145 = vector.load %arg6[%c0_82, %c0_83] : memref<32x1xf32, #tpu.memory_space<vmem>>, vector<32x1xf32>
      %cst_84 = arith.constant dense<0.000000e+00> : vector<32x128xf32>
      %146 = tpu.matmul %144, %143, %cst_84 {dimension_numbers = #tpu.dot_dimension_numbers<[1], [0], [0], [1], [0, 0, 1, 1], [], []>} : vector<32x32xbf16>, vector<32x128xbf16>, vector<32x128xf32> -> vector<32x128xf32>
      %147 = vector.broadcast %145 : vector<32x1xf32> to vector<32x128xf32>
      %148 = arith.addf %146, %147 : vector<32x128xf32>
      %cst_85 = arith.constant 0.000000e+00 : f32
      %149 = vector.broadcast %cst_85 : f32 to vector<32x128xf32>
      %150 = arith.maximumf %148, %149 : vector<32x128xf32>
      %151 = arith.truncf %150 : vector<32x128xf32> to vector<32x128xbf16>
      %c0_86 = arith.constant 0 : index
      %c0_87 = arith.constant 0 : index
      %152 = vector.load %arg7[%c0_86, %c0_87] : memref<32x32xbf16, #tpu.memory_space<vmem>>, vector<32x32xbf16>
      %c0_88 = arith.constant 0 : index
      %c0_89 = arith.constant 0 : index
      %153 = vector.load %arg8[%c0_88, %c0_89] : memref<32x1xf32, #tpu.memory_space<vmem>>, vector<32x1xf32>
      %cst_90 = arith.constant dense<0.000000e+00> : vector<32x128xf32>
      %154 = tpu.matmul %152, %151, %cst_90 {dimension_numbers = #tpu.dot_dimension_numbers<[1], [0], [0], [1], [0, 0, 1, 1], [], []>} : vector<32x32xbf16>, vector<32x128xbf16>, vector<32x128xf32> -> vector<32x128xf32>
      %155 = vector.broadcast %153 : vector<32x1xf32> to vector<32x128xf32>
      %156 = arith.addf %154, %155 : vector<32x128xf32>
      %cst_91 = arith.constant 0.000000e+00 : f32
      %157 = vector.broadcast %cst_91 : f32 to vector<32x128xf32>
      %158 = arith.maximumf %156, %157 : vector<32x128xf32>
      %159 = arith.truncf %158 : vector<32x128xf32> to vector<32x128xbf16>
      %c0_92 = arith.constant 0 : index
      %c0_93 = arith.constant 0 : index
      %160 = vector.load %arg9[%c0_92, %c0_93] : memref<16x32xbf16, #tpu.memory_space<vmem>>, vector<16x32xbf16>
      %cst_94 = arith.constant dense<0.000000e+00> : vector<16x128xf32>
      %161 = tpu.matmul %160, %159, %cst_94 {dimension_numbers = #tpu.dot_dimension_numbers<[1], [0], [0], [1], [0, 0, 1, 1], [], []>} : vector<16x32xbf16>, vector<32x128xbf16>, vector<16x128xf32> -> vector<16x128xf32>
      %c0_95 = arith.constant 0 : index
      %c0_96 = arith.constant 0 : index
      %162 = vector.load %arg10[%c0_95, %c0_96] : memref<16x1xf32, #tpu.memory_space<vmem>>, vector<16x1xf32>
      %163 = vector.broadcast %162 : vector<16x1xf32> to vector<16x128xf32>
      %164 = arith.addf %161, %163 : vector<16x128xf32>
      %165 = vector.extract_strided_slice %164 {offsets = [0, 0], sizes = [8, 128], strides = [1, 1]} : vector<16x128xf32> to vector<8x128xf32>
      %c0_97 = arith.constant 0 : index
      %c0_98 = arith.constant 0 : index
      %166 = vector.load %arg16[%c0_97, %c0_98] : memref<8x128xf32, #tpu.memory_space<vmem>>, vector<8x128xf32>
      tpu.vector_store %arg16[%c0_97, %c0_98], %165 {strides = array<i32>} : memref<8x128xf32, #tpu.memory_space<vmem>>, vector<8x128xf32>,
      %167 = vector.extract_strided_slice %164 {offsets = [8, 0], sizes = [8, 128], strides = [1, 1]} : vector<16x128xf32> to vector<8x128xf32>
      %cst_99 = arith.constant 5.000000e-01 : f32
      %168 = vector.broadcast %cst_99 : f32 to vector<8x128xf32>
      %169 = arith.mulf %168, %167 : vector<8x128xf32>
      %170 = math.exp %169 : vector<8x128xf32>
      %c0_100 = arith.constant 0 : index
      %c0_101 = arith.constant 0 : index
      %171 = vector.load %arg17[%c0_100, %c0_101] : memref<8x128xf32, #tpu.memory_space<vmem>>, vector<8x128xf32>
      tpu.vector_store %arg17[%c0_100, %c0_101], %170 {strides = array<i32>} : memref<8x128xf32, #tpu.memory_space<vmem>>, vector<8x128xf32>,
    } else {
    }
    %c0 = arith.constant 0 : index
    %c0_1 = arith.constant 0 : index
    %3 = vector.load %arg16[%c0, %c0_1] : memref<8x128xf32, #tpu.memory_space<vmem>>, vector<8x128xf32>
    %c0_2 = arith.constant 0 : index
    %c0_3 = arith.constant 0 : index
    %4 = vector.load %arg17[%c0_2, %c0_3] : memref<8x128xf32, #tpu.memory_space<vmem>>, vector<8x128xf32>
    %c0_4 = arith.constant 0 : index
    %c0_5 = arith.constant 0 : index
    %5 = vector.load %arg11[%c0_4, %c0_5] : memref<16x8xbf16, #tpu.memory_space<vmem>>, vector<16x8xbf16>
    %c0_6 = arith.constant 0 : index
    %c0_7 = arith.constant 0 : index
    %6 = vector.load %arg12[%c0_6, %c0_7] : memref<16x1xf32, #tpu.memory_space<vmem>>, vector<16x1xf32>
    %7 = vector.shape_cast %6 : vector<16x1xf32> to vector<16x1xf32>
    %8 = vector.broadcast %7 : vector<16x1xf32> to vector<16x128xf32>
    %c0_8 = arith.constant 0 : index
    %c0_9 = arith.constant 0 : index
    %9 = vector.load %arg13[%c0_8, %c0_9] : memref<16x1xf32, #tpu.memory_space<vmem>>, vector<16x1xf32>
    %10 = vector.shape_cast %9 : vector<16x1xf32> to vector<16x1xf32>
    %11 = vector.broadcast %10 : vector<16x1xf32> to vector<16x128xf32>
    %c0_10 = arith.constant 0 : index
    %c0_11 = arith.constant 0 : index
    %12 = vector.load %arg14[%c0_10, %c0_11] : memref<16x1xf32, #tpu.memory_space<vmem>>, vector<16x1xf32>
    %13 = vector.shape_cast %12 : vector<16x1xf32> to vector<16x1xf32>
    %14 = vector.broadcast %13 : vector<16x1xf32> to vector<16x128xf32>
    %c0_12 = arith.constant 0 : index
    %c0_13 = arith.constant 0 : index
    %c0_14 = arith.constant 0 : index
    %15 = vector.load %arg15[%c0_12, %c0_13, %c0_14] : memref<6x8x128xf32, #tpu.memory_space<vmem>>, vector<1x8x128xf32>
    %16 = vector.shape_cast %15 : vector<1x8x128xf32> to vector<8x128xf32>
    %17 = arith.mulf %4, %16 : vector<8x128xf32>
    %18 = arith.addf %3, %17 : vector<8x128xf32>
    %c0_15 = arith.constant 0 : index
    %c0_16 = arith.constant 0 : index
    %c0_17 = arith.constant 0 : index
    %19 = vector.load %arg18[%c0_15, %c0_16, %c0_17] : memref<6x8x128xf32, #tpu.memory_space<vmem>>, vector<1x8x128xf32>
    %20 = vector.shape_cast %19 : vector<1x8x128xf32> to vector<8x128xf32>
    %21 = vector.shape_cast %18 : vector<8x128xf32> to vector<1x8x128xf32>
    tpu.vector_store %arg18[%c0_15, %c0_16, %c0_17], %21 {strides = array<i32>} : memref<6x8x128xf32, #tpu.memory_space<vmem>>, vector<1x8x128xf32>,
    %22 = arith.truncf %18 : vector<8x128xf32> to vector<8x128xbf16>
    %cst = arith.constant dense<0.000000e+00> : vector<16x128xf32>
    %23 = tpu.matmul %5, %22, %cst {dimension_numbers = #tpu.dot_dimension_numbers<[1], [0], [0], [1], [0, 0, 1, 1], [], []>} : vector<16x8xbf16>, vector<8x128xbf16>, vector<16x128xf32> -> vector<16x128xf32>
    %24 = arith.addf %23, %8 : vector<16x128xf32>
    %25 = arith.negf %24 : vector<16x128xf32>
    %26 = math.exp %25 : vector<16x128xf32>
    %cst_18 = arith.constant 1.000000e+00 : f32
    %27 = vector.broadcast %cst_18 : f32 to vector<16x128xf32>
    %28 = arith.addf %27, %26 : vector<16x128xf32>
    %29 = arith.divf %27, %28 : vector<16x128xf32>
    %30 = arith.mulf %14, %29 : vector<16x128xf32>
    %31 = arith.addf %11, %30 : vector<16x128xf32>
    %c0_19 = arith.constant 0 : index
    %c0_20 = arith.constant 0 : index
    %c0_21 = arith.constant 0 : index
    %32 = vector.load %arg19[%c0_19, %c0_20, %c0_21] : memref<6x16x128xf32, #tpu.memory_space<vmem>>, vector<1x16x128xf32>
    %33 = vector.shape_cast %32 : vector<1x16x128xf32> to vector<16x128xf32>
    %34 = vector.shape_cast %31 : vector<16x128xf32> to vector<1x16x128xf32>
    tpu.vector_store %arg19[%c0_19, %c0_20, %c0_21], %34 {strides = array<i32>} : memref<6x16x128xf32, #tpu.memory_space<vmem>>, vector<1x16x128xf32>,
    %c1 = arith.constant 1 : index
    %c0_22 = arith.constant 0 : index
    %c0_23 = arith.constant 0 : index
    %35 = vector.load %arg15[%c1, %c0_22, %c0_23] : memref<6x8x128xf32, #tpu.memory_space<vmem>>, vector<1x8x128xf32>
    %36 = vector.shape_cast %35 : vector<1x8x128xf32> to vector<8x128xf32>
    %37 = arith.mulf %4, %36 : vector<8x128xf32>
    %38 = arith.addf %3, %37 : vector<8x128xf32>
    %c1_24 = arith.constant 1 : index
    %c0_25 = arith.constant 0 : index
    %c0_26 = arith.constant 0 : index
    %39 = vector.load %arg18[%c1_24, %c0_25, %c0_26] : memref<6x8x128xf32, #tpu.memory_space<vmem>>, vector<1x8x128xf32>
    %40 = vector.shape_cast %39 : vector<1x8x128xf32> to vector<8x128xf32>
    %41 = vector.shape_cast %38 : vector<8x128xf32> to vector<1x8x128xf32>
    tpu.vector_store %arg18[%c1_24, %c0_25, %c0_26], %41 {strides = array<i32>} : memref<6x8x128xf32, #tpu.memory_space<vmem>>, vector<1x8x128xf32>,
    %42 = arith.truncf %38 : vector<8x128xf32> to vector<8x128xbf16>
    %cst_27 = arith.constant dense<0.000000e+00> : vector<16x128xf32>
    %43 = tpu.matmul %5, %42, %cst_27 {dimension_numbers = #tpu.dot_dimension_numbers<[1], [0], [0], [1], [0, 0, 1, 1], [], []>} : vector<16x8xbf16>, vector<8x128xbf16>, vector<16x128xf32> -> vector<16x128xf32>
    %44 = arith.addf %43, %8 : vector<16x128xf32>
    %45 = arith.negf %44 : vector<16x128xf32>
    %46 = math.exp %45 : vector<16x128xf32>
    %cst_28 = arith.constant 1.000000e+00 : f32
    %47 = vector.broadcast %cst_28 : f32 to vector<16x128xf32>
    %48 = arith.addf %47, %46 : vector<16x128xf32>
    %49 = arith.divf %47, %48 : vector<16x128xf32>
    %50 = arith.mulf %14, %49 : vector<16x128xf32>
    %51 = arith.addf %11, %50 : vector<16x128xf32>
    %c1_29 = arith.constant 1 : index
    %c0_30 = arith.constant 0 : index
    %c0_31 = arith.constant 0 : index
    %52 = vector.load %arg19[%c1_29, %c0_30, %c0_31] : memref<6x16x128xf32, #tpu.memory_space<vmem>>, vector<1x16x128xf32>
    %53 = vector.shape_cast %52 : vector<1x16x128xf32> to vector<16x128xf32>
    %54 = vector.shape_cast %51 : vector<16x128xf32> to vector<1x16x128xf32>
    tpu.vector_store %arg19[%c1_29, %c0_30, %c0_31], %54 {strides = array<i32>} : memref<6x16x128xf32, #tpu.memory_space<vmem>>, vector<1x16x128xf32>,
    %c2 = arith.constant 2 : index
    %c0_32 = arith.constant 0 : index
    %c0_33 = arith.constant 0 : index
    %55 = vector.load %arg15[%c2, %c0_32, %c0_33] : memref<6x8x128xf32, #tpu.memory_space<vmem>>, vector<1x8x128xf32>
    %56 = vector.shape_cast %55 : vector<1x8x128xf32> to vector<8x128xf32>
    %57 = arith.mulf %4, %56 : vector<8x128xf32>
    %58 = arith.addf %3, %57 : vector<8x128xf32>
    %c2_34 = arith.constant 2 : index
    %c0_35 = arith.constant 0 : index
    %c0_36 = arith.constant 0 : index
    %59 = vector.load %arg18[%c2_34, %c0_35, %c0_36] : memref<6x8x128xf32, #tpu.memory_space<vmem>>, vector<1x8x128xf32>
    %60 = vector.shape_cast %59 : vector<1x8x128xf32> to vector<8x128xf32>
    %61 = vector.shape_cast %58 : vector<8x128xf32> to vector<1x8x128xf32>
    tpu.vector_store %arg18[%c2_34, %c0_35, %c0_36], %61 {strides = array<i32>} : memref<6x8x128xf32, #tpu.memory_space<vmem>>, vector<1x8x128xf32>,
    %62 = arith.truncf %58 : vector<8x128xf32> to vector<8x128xbf16>
    %cst_37 = arith.constant dense<0.000000e+00> : vector<16x128xf32>
    %63 = tpu.matmul %5, %62, %cst_37 {dimension_numbers = #tpu.dot_dimension_numbers<[1], [0], [0], [1], [0, 0, 1, 1], [], []>} : vector<16x8xbf16>, vector<8x128xbf16>, vector<16x128xf32> -> vector<16x128xf32>
    %64 = arith.addf %63, %8 : vector<16x128xf32>
    %65 = arith.negf %64 : vector<16x128xf32>
    %66 = math.exp %65 : vector<16x128xf32>
    %cst_38 = arith.constant 1.000000e+00 : f32
    %67 = vector.broadcast %cst_38 : f32 to vector<16x128xf32>
    %68 = arith.addf %67, %66 : vector<16x128xf32>
    %69 = arith.divf %67, %68 : vector<16x128xf32>
    %70 = arith.mulf %14, %69 : vector<16x128xf32>
    %71 = arith.addf %11, %70 : vector<16x128xf32>
    %c2_39 = arith.constant 2 : index
    %c0_40 = arith.constant 0 : index
    %c0_41 = arith.constant 0 : index
    %72 = vector.load %arg19[%c2_39, %c0_40, %c0_41] : memref<6x16x128xf32, #tpu.memory_space<vmem>>, vector<1x16x128xf32>
    %73 = vector.shape_cast %72 : vector<1x16x128xf32> to vector<16x128xf32>
    %74 = vector.shape_cast %71 : vector<16x128xf32> to vector<1x16x128xf32>
    tpu.vector_store %arg19[%c2_39, %c0_40, %c0_41], %74 {strides = array<i32>} : memref<6x16x128xf32, #tpu.memory_space<vmem>>, vector<1x16x128xf32>,
    %c3 = arith.constant 3 : index
    %c0_42 = arith.constant 0 : index
    %c0_43 = arith.constant 0 : index
    %75 = vector.load %arg15[%c3, %c0_42, %c0_43] : memref<6x8x128xf32, #tpu.memory_space<vmem>>, vector<1x8x128xf32>
    %76 = vector.shape_cast %75 : vector<1x8x128xf32> to vector<8x128xf32>
    %77 = arith.mulf %4, %76 : vector<8x128xf32>
    %78 = arith.addf %3, %77 : vector<8x128xf32>
    %c3_44 = arith.constant 3 : index
    %c0_45 = arith.constant 0 : index
    %c0_46 = arith.constant 0 : index
    %79 = vector.load %arg18[%c3_44, %c0_45, %c0_46] : memref<6x8x128xf32, #tpu.memory_space<vmem>>, vector<1x8x128xf32>
    %80 = vector.shape_cast %79 : vector<1x8x128xf32> to vector<8x128xf32>
    %81 = vector.shape_cast %78 : vector<8x128xf32> to vector<1x8x128xf32>
    tpu.vector_store %arg18[%c3_44, %c0_45, %c0_46], %81 {strides = array<i32>} : memref<6x8x128xf32, #tpu.memory_space<vmem>>, vector<1x8x128xf32>,
    %82 = arith.truncf %78 : vector<8x128xf32> to vector<8x128xbf16>
    %cst_47 = arith.constant dense<0.000000e+00> : vector<16x128xf32>
    %83 = tpu.matmul %5, %82, %cst_47 {dimension_numbers = #tpu.dot_dimension_numbers<[1], [0], [0], [1], [0, 0, 1, 1], [], []>} : vector<16x8xbf16>, vector<8x128xbf16>, vector<16x128xf32> -> vector<16x128xf32>
    %84 = arith.addf %83, %8 : vector<16x128xf32>
    %85 = arith.negf %84 : vector<16x128xf32>
    %86 = math.exp %85 : vector<16x128xf32>
    %cst_48 = arith.constant 1.000000e+00 : f32
    %87 = vector.broadcast %cst_48 : f32 to vector<16x128xf32>
    %88 = arith.addf %87, %86 : vector<16x128xf32>
    %89 = arith.divf %87, %88 : vector<16x128xf32>
    %90 = arith.mulf %14, %89 : vector<16x128xf32>
    %91 = arith.addf %11, %90 : vector<16x128xf32>
    %c3_49 = arith.constant 3 : index
    %c0_50 = arith.constant 0 : index
    %c0_51 = arith.constant 0 : index
    %92 = vector.load %arg19[%c3_49, %c0_50, %c0_51] : memref<6x16x128xf32, #tpu.memory_space<vmem>>, vector<1x16x128xf32>
    %93 = vector.shape_cast %92 : vector<1x16x128xf32> to vector<16x128xf32>
    %94 = vector.shape_cast %91 : vector<16x128xf32> to vector<1x16x128xf32>
    tpu.vector_store %arg19[%c3_49, %c0_50, %c0_51], %94 {strides = array<i32>} : memref<6x16x128xf32, #tpu.memory_space<vmem>>, vector<1x16x128xf32>,
    %c4 = arith.constant 4 : index
    %c0_52 = arith.constant 0 : index
    %c0_53 = arith.constant 0 : index
    %95 = vector.load %arg15[%c4, %c0_52, %c0_53] : memref<6x8x128xf32, #tpu.memory_space<vmem>>, vector<1x8x128xf32>
    %96 = vector.shape_cast %95 : vector<1x8x128xf32> to vector<8x128xf32>
    %97 = arith.mulf %4, %96 : vector<8x128xf32>
    %98 = arith.addf %3, %97 : vector<8x128xf32>
    %c4_54 = arith.constant 4 : index
    %c0_55 = arith.constant 0 : index
    %c0_56 = arith.constant 0 : index
    %99 = vector.load %arg18[%c4_54, %c0_55, %c0_56] : memref<6x8x128xf32, #tpu.memory_space<vmem>>, vector<1x8x128xf32>
    %100 = vector.shape_cast %99 : vector<1x8x128xf32> to vector<8x128xf32>
    %101 = vector.shape_cast %98 : vector<8x128xf32> to vector<1x8x128xf32>
    tpu.vector_store %arg18[%c4_54, %c0_55, %c0_56], %101 {strides = array<i32>} : memref<6x8x128xf32, #tpu.memory_space<vmem>>, vector<1x8x128xf32>,
    %102 = arith.truncf %98 : vector<8x128xf32> to vector<8x128xbf16>
    %cst_57 = arith.constant dense<0.000000e+00> : vector<16x128xf32>
    %103 = tpu.matmul %5, %102, %cst_57 {dimension_numbers = #tpu.dot_dimension_numbers<[1], [0], [0], [1], [0, 0, 1, 1], [], []>} : vector<16x8xbf16>, vector<8x128xbf16>, vector<16x128xf32> -> vector<16x128xf32>
    %104 = arith.addf %103, %8 : vector<16x128xf32>
    %105 = arith.negf %104 : vector<16x128xf32>
    %106 = math.exp %105 : vector<16x128xf32>
    %cst_58 = arith.constant 1.000000e+00 : f32
    %107 = vector.broadcast %cst_58 : f32 to vector<16x128xf32>
    %108 = arith.addf %107, %106 : vector<16x128xf32>
    %109 = arith.divf %107, %108 : vector<16x128xf32>
    %110 = arith.mulf %14, %109 : vector<16x128xf32>
    %111 = arith.addf %11, %110 : vector<16x128xf32>
    %c4_59 = arith.constant 4 : index
    %c0_60 = arith.constant 0 : index
    %c0_61 = arith.constant 0 : index
    %112 = vector.load %arg19[%c4_59, %c0_60, %c0_61] : memref<6x16x128xf32, #tpu.memory_space<vmem>>, vector<1x16x128xf32>
    %113 = vector.shape_cast %112 : vector<1x16x128xf32> to vector<16x128xf32>
    %114 = vector.shape_cast %111 : vector<16x128xf32> to vector<1x16x128xf32>
    tpu.vector_store %arg19[%c4_59, %c0_60, %c0_61], %114 {strides = array<i32>} : memref<6x16x128xf32, #tpu.memory_space<vmem>>, vector<1x16x128xf32>,
    %c5 = arith.constant 5 : index
    %c0_62 = arith.constant 0 : index
    %c0_63 = arith.constant 0 : index
    %115 = vector.load %arg15[%c5, %c0_62, %c0_63] : memref<6x8x128xf32, #tpu.memory_space<vmem>>, vector<1x8x128xf32>
    %116 = vector.shape_cast %115 : vector<1x8x128xf32> to vector<8x128xf32>
    %117 = arith.mulf %4, %116 : vector<8x128xf32>
    %118 = arith.addf %3, %117 : vector<8x128xf32>
    %c5_64 = arith.constant 5 : index
    %c0_65 = arith.constant 0 : index
    %c0_66 = arith.constant 0 : index
    %119 = vector.load %arg18[%c5_64, %c0_65, %c0_66] : memref<6x8x128xf32, #tpu.memory_space<vmem>>, vector<1x8x128xf32>
    %120 = vector.shape_cast %119 : vector<1x8x128xf32> to vector<8x128xf32>
    %121 = vector.shape_cast %118 : vector<8x128xf32> to vector<1x8x128xf32>
    tpu.vector_store %arg18[%c5_64, %c0_65, %c0_66], %121 {strides = array<i32>} : memref<6x8x128xf32, #tpu.memory_space<vmem>>, vector<1x8x128xf32>,
    %122 = arith.truncf %118 : vector<8x128xf32> to vector<8x128xbf16>
    %cst_67 = arith.constant dense<0.000000e+00> : vector<16x128xf32>
    %123 = tpu.matmul %5, %122, %cst_67 {dimension_numbers = #tpu.dot_dimension_numbers<[1], [0], [0], [1], [0, 0, 1, 1], [], []>} : vector<16x8xbf16>, vector<8x128xbf16>, vector<16x128xf32> -> vector<16x128xf32>
    %124 = arith.addf %123, %8 : vector<16x128xf32>
    %125 = arith.negf %124 : vector<16x128xf32>
    %126 = math.exp %125 : vector<16x128xf32>
    %cst_68 = arith.constant 1.000000e+00 : f32
    %127 = vector.broadcast %cst_68 : f32 to vector<16x128xf32>
    %128 = arith.addf %127, %126 : vector<16x128xf32>
    %129 = arith.divf %127, %128 : vector<16x128xf32>
    %130 = arith.mulf %14, %129 : vector<16x128xf32>
    %131 = arith.addf %11, %130 : vector<16x128xf32>
    %c5_69 = arith.constant 5 : index
    %c0_70 = arith.constant 0 : index
    %c0_71 = arith.constant 0 : index
    %132 = vector.load %arg19[%c5_69, %c0_70, %c0_71] : memref<6x16x128xf32, #tpu.memory_space<vmem>>, vector<1x16x128xf32>
    %133 = vector.shape_cast %132 : vector<1x16x128xf32> to vector<16x128xf32>
    %134 = vector.shape_cast %131 : vector<16x128xf32> to vector<1x16x128xf32>
    tpu.vector_store %arg19[%c5_69, %c0_70, %c0_71], %134 {strides = array<i32>} : memref<6x16x128xf32, #tpu.memory_space<vmem>>, vector<1x16x128xf32>,
    return
  }
  func.func @transform_0(%arg0: i32, %arg1: i32) -> (i32, i32) {
    %c0_i32 = arith.constant 0 : i32
    %c0_i32_0 = arith.constant 0 : i32
    return %c0_i32, %arg0 : i32, i32
  }
  func.func @transform_1(%arg0: i32, %arg1: i32) -> (i32, i32) {
    %c0_i32 = arith.constant 0 : i32
    %c0_i32_0 = arith.constant 0 : i32
    %c0_i32_1 = arith.constant 0 : i32
    return %c0_i32, %c0_i32_0 : i32, i32
  }
  func.func @transform_2(%arg0: i32, %arg1: i32) -> (i32, i32) {
    %c0_i32 = arith.constant 0 : i32
    %c0_i32_0 = arith.constant 0 : i32
    %c0_i32_1 = arith.constant 0 : i32
    return %c0_i32, %c0_i32_0 : i32, i32
  }
  func.func @transform_3(%arg0: i32, %arg1: i32) -> (i32, i32) {
    %c0_i32 = arith.constant 0 : i32
    %c0_i32_0 = arith.constant 0 : i32
    %c0_i32_1 = arith.constant 0 : i32
    return %c0_i32, %c0_i32_0 : i32, i32
  }
  func.func @transform_4(%arg0: i32, %arg1: i32) -> (i32, i32) {
    %c0_i32 = arith.constant 0 : i32
    %c0_i32_0 = arith.constant 0 : i32
    %c0_i32_1 = arith.constant 0 : i32
    return %c0_i32, %c0_i32_0 : i32, i32
  }
  func.func @transform_5(%arg0: i32, %arg1: i32) -> (i32, i32) {
    %c0_i32 = arith.constant 0 : i32
    %c0_i32_0 = arith.constant 0 : i32
    %c0_i32_1 = arith.constant 0 : i32
    return %c0_i32, %c0_i32_0 : i32, i32
  }
  func.func @transform_6(%arg0: i32, %arg1: i32) -> (i32, i32) {
    %c0_i32 = arith.constant 0 : i32
    %c0_i32_0 = arith.constant 0 : i32
    %c0_i32_1 = arith.constant 0 : i32
    return %c0_i32, %c0_i32_0 : i32, i32
  }
  func.func @transform_7(%arg0: i32, %arg1: i32) -> (i32, i32) {
    %c0_i32 = arith.constant 0 : i32
    %c0_i32_0 = arith.constant 0 : i32
    %c0_i32_1 = arith.constant 0 : i32
    return %c0_i32, %c0_i32_0 : i32, i32
  }
  func.func @transform_8(%arg0: i32, %arg1: i32) -> (i32, i32) {
    %c0_i32 = arith.constant 0 : i32
    %c0_i32_0 = arith.constant 0 : i32
    %c0_i32_1 = arith.constant 0 : i32
    return %c0_i32, %c0_i32_0 : i32, i32
  }
  func.func @transform_9(%arg0: i32, %arg1: i32) -> (i32, i32) {
    %c0_i32 = arith.constant 0 : i32
    %c0_i32_0 = arith.constant 0 : i32
    %c0_i32_1 = arith.constant 0 : i32
    return %c0_i32, %c0_i32_0 : i32, i32
  }
  func.func @transform_10(%arg0: i32, %arg1: i32) -> (i32, i32) {
    %c0_i32 = arith.constant 0 : i32
    %c0_i32_0 = arith.constant 0 : i32
    %c0_i32_1 = arith.constant 0 : i32
    return %c0_i32, %c0_i32_0 : i32, i32
  }
  func.func @transform_11(%arg0: i32, %arg1: i32) -> (i32, i32) {
    %c0_i32 = arith.constant 0 : i32
    %c0_i32_0 = arith.constant 0 : i32
    %c0_i32_1 = arith.constant 0 : i32
    return %c0_i32, %c0_i32_0 : i32, i32
  }
  func.func @transform_12(%arg0: i32, %arg1: i32) -> (i32, i32) {
    %c0_i32 = arith.constant 0 : i32
    %c0_i32_0 = arith.constant 0 : i32
    %c0_i32_1 = arith.constant 0 : i32
    return %c0_i32, %c0_i32_0 : i32, i32
  }
  func.func @transform_13(%arg0: i32, %arg1: i32) -> (i32, i32, i32) {
    %c0_i32 = arith.constant 0 : i32
    %c0_i32_0 = arith.constant 0 : i32
    return %arg1, %c0_i32, %arg0 : i32, i32, i32
  }
  func.func @transform_14(%arg0: i32, %arg1: i32) -> (i32, i32) {
    %c0_i32 = arith.constant 0 : i32
    %c0_i32_0 = arith.constant 0 : i32
    return %c0_i32, %arg0 : i32, i32
  }
  func.func @transform_15(%arg0: i32, %arg1: i32) -> (i32, i32) {
    %c0_i32 = arith.constant 0 : i32
    %c0_i32_0 = arith.constant 0 : i32
    return %c0_i32, %arg0 : i32, i32
  }
  func.func @transform_16(%arg0: i32, %arg1: i32) -> (i32, i32, i32) {
    %c0_i32 = arith.constant 0 : i32
    %c0_i32_0 = arith.constant 0 : i32
    return %arg1, %c0_i32, %arg0 : i32, i32, i32
  }
  func.func @transform_17(%arg0: i32, %arg1: i32) -> (i32, i32, i32) {
    %c0_i32 = arith.constant 0 : i32
    %c0_i32_0 = arith.constant 0 : i32
    return %arg1, %c0_i32, %arg0 : i32, i32, i32
  }
}

</mosaic_0001>

<bundles_post_ra>
// kernel: tpu_custom_call.1
= control target key start
LH: loop header
LB: loop body
LE: loop exit
PB: predicated region body
PF: predicated region fallthrough
CT: control target
= control target key end

     0   :  { %s1576_s0 = inlined_call_operand.vmem [shape: bf16[16,128], index: 0, kind: input, shape index: {}]   ;;  %s1577_s1 = inlined_call_operand.vmem [shape: bf16[32,16], index: 1, kind: input, shape index: {}]   ;;  %s1578_s2 = inlined_call_operand.vmem [shape: f32[32,1], index: 2, kind: input, shape index: {}]   ;;  %s1579_s3 = inlined_call_operand.vmem [shape: bf16[32,32], index: 3, kind: input, shape index: {}]   ;;  %s1580_s4 = inlined_call_operand.vmem [shape: f32[32,1], index: 4, kind: input, shape index: {}]   ;;  %s1581_s5 = inlined_call_operand.vmem [shape: bf16[32,32], index: 5, kind: input, shape index: {}]   ;;  %s1582_s6 = inlined_call_operand.vmem [shape: f32[32,1], index: 6, kind: input, shape index: {}]   ;;  %s1583_s7 = inlined_call_operand.vmem [shape: bf16[16,32], index: 7, kind: input, shape index: {}]   ;;  %s1584_s8 = inlined_call_operand.vmem [shape: f32[16,1], index: 8, kind: input, shape index: {}]   ;;  %s1585_s9 = inlined_call_operand.vmem [shape: bf16[16,8], index: 9, kind: input, shape index: {}]   ;;  %s1586_s10 = inlined_call_operand.vmem [shape: f32[16,1], index: 10, kind: input, shape index: {}]   ;;  %s1587_s11 = inlined_call_operand.vmem [shape: f32[16,1], index: 11, kind: input, shape index: {}]   ;;  %s1588_s12 = inlined_call_operand.vmem [shape: f32[16,1], index: 12, kind: input, shape index: {}]   ;;  %s1589_s13 = inlined_call_operand.vmem [shape: f32[6,8,128], index: 13, kind: input, shape index: {}]   ;;  %s1590_s14 = inlined_call_operand.hbm [shape: f32[8,128], index: 14, kind: output, shape index: {0}]   ;;  %s1591_s15 = inlined_call_operand.hbm [shape: f32[8,128], index: 15, kind: output, shape index: {1}]   ;;  %s1592_s16 = inlined_call_operand.hbm [shape: f32[6,8,128], index: 16, kind: output, shape index: {2}]   ;;  %s1593_s17 = inlined_call_operand.hbm [shape: f32[6,16,128], index: 17, kind: output, shape index: {3}]  }
   0x1   :  { %1595 = sst [smem:[#allocation12_spill]] %s1576_s0 }
   0x2   :  { %1596 = sst [smem:[#allocation13_spill]] %s1577_s1 }
   0x3   :  { %23 = vsyncpa [#allocation3], 0 }
   0x4   :  { %24 = vsyncpa [#allocation5], 0  ;;  %s1597_s26 = sld [smem:[#allocation12_spill]]  ;;  %vm105_vm0 = vcmask 130048   ;;  %s1598_s29 = sld [smem:[#allocation13_spill]]  ;;  %v1255_v3 = vmov 0  }
   0x5   :  { %1100 = vset.pattern.permute.xlu0 %v1255_v3  ;;  %v65_v4 = vld [vmem:[%s1578_s2] sm:$0xff]  ;;  %v67_v5 = vld [vmem:[%s1578_s2 + $0x10] sm:$0xff]  ;;  %1101 = vset.pattern.permute.xlu1 %v1255_v3  ;;  %v66_v6 = vld [vmem:[%s1578_s2 + $0x8] sm:$0xff] }
   0x6   :  { %71 = vperm.xlu0 %1100, %v65_v4   ;;  %81 = vperm.xlu1 %1101, %v67_v5   ;;  %v68_v7 = vld [vmem:[%s1578_s2 + $0x18] sm:$0xff]  ;;  %v171_v8 = vld [vmem:[%s1580_s4] sm:$0xff]  ;;  %v172_v9 = vld [vmem:[%s1580_s4 + $0x8] sm:$0xff] }
   0x7   :  { %v173_v10 = vld [vmem:[%s1580_s4 + $0x10] sm:$0xff] }
   0xa   :  { %v1102_v0 = vld [vmem:[%s1597_s26] sm:$0xff]   ;;  %v1104_v2 = vld [vmem:[%s1598_s29 + $0x8] sm:$0xff]   ;;  %76 = vperm.xlu0 %1100, %v66_v6   ;;  %86 = vperm.xlu1 %1101, %v68_v7  }
   0xb   :  { %v1103_v1 = vld [vmem:[%s1598_s29] sm:$0xff]   ;;  %1025 = vmatprep.subr.bf16.mxu0 %v1102_v0 }
   0xc   :  { %1026 = vmatpush3.bf16.msra.mxu0 %v1102_v0  ;;  %1027 = vmatprep.mubr.msk.bf16.mxu0 %vm105_vm0, %v1103_v1 }
   0xe   :  { %177 = vperm.xlu0 %1100, %v171_v8   ;;  %182 = vperm.xlu1 %1101, %v172_v9  }
   0xf   :  { %1028 = vmatmul.mubr.msk.bf16.vlgmr.msra.gmra.mrb[0].mxu0 %vm105_vm0, %v1104_v2 }
  0x10   :  { %25 = vsyncpa [#allocation8], 0  ;;  %v174_v11 = vld [vmem:[%s1580_s4 + $0x18] sm:$0xff]  ;;  %v271_v12 = vld [vmem:[%s1582_s6] sm:$0xff]  ;;  %vm205_vm1 = vcmask 261120   ;;  %v1256_v0 = vmov 0.0  }
  0x11   :  { %v272_v13 = vld [vmem:[%s1582_s6 + $0x8] sm:$0xff]  ;;  %v273_v14 = vld [vmem:[%s1582_s6 + $0x10] sm:$0xff]  ;;  %v274_v15 = vld [vmem:[%s1582_s6 + $0x18] sm:$0xff]  ;;  %vm1257_vm2 = vmmov 0   ;;  %vm488_vm3 = vcmask 1043456   ;;  %vm484_vm4 = vcmask 64512  }
  0x12   :  { %187 = vperm.xlu0 %1100, %v173_v10   ;;  %192 = vperm.xlu1 %1101, %v174_v11   ;;  %v369_v16 = vld [vmem:[%s1584_s8 + $0x8] sm:$0xff]  ;;  %v368_v17 = vld [vmem:[%s1584_s8] sm:$0xff]  ;;  %s1259_s21 = smov [#allocation2]  }
  0x13   :  { %v438_v18 = vld [vmem:[%s1586_s10] sm:$0xff]  ;;  %v439_v19 = vld [vmem:[%s1586_s10 + $0x8] sm:$0xff]  ;;  %s907_s10 = sshll.u32 %s1259_s21, 4  ;;  %s908_s10 = int_to_ptr.vmem [resolvable:$true] %s907_s10 }
  0x14   :  { %v462_v20 = vld [vmem:[%s1588_s12] sm:$0xff]  ;;  %v463_v21 = vld [vmem:[%s1588_s12 + $0x8] sm:$0xff] }
  0x15   :  { %v450_v22 = vld [vmem:[%s1587_s11] sm:$0xff]  ;;  %v451_v23 = vld [vmem:[%s1587_s11 + $0x8] sm:$0xff] }
  0x16   :  { %277 = vperm.xlu0 %1100, %v271_v12   ;;  %282 = vperm.xlu1 %1101, %v272_v13   ;;  %v1105_v24 = vld [vmem:[%s1579_s3] sm:$0xff]   ;;  %v1106_v43 = vld [vmem:[%s1579_s3 + $0x8] sm:$0xff]  }
  0x17   :  { %1035 = vmatprep.mubr.msk.bf16.mxu1 %vm205_vm1, %v1105_v24  ;;  %v1107_v44 = vld [vmem:[%s1581_s5] sm:$0xff]   ;;  %v1108_v63 = vld [vmem:[%s1581_s5 + $0x8] sm:$0xff]  }
  0x18   :  { %1043 = vmatprep.mubr.msk.bf16.mxu0 %vm205_vm1, %v1107_v44 }
  0x1a   :  { %287 = vperm.xlu0 %1100, %v273_v14   ;;  %292 = vperm.xlu1 %1101, %v274_v15  }
  0x1e   :  { %377 = vperm.xlu0 %1100, %v369_v16   ;;  %372 = vperm.xlu1 %1101, %v368_v17  }
  0x22   :  { %442 = vperm.xlu0 %1100, %v438_v18   ;;  %447 = vperm.xlu1 %1101, %v439_v19   ;;  %v1109_v19 = vld [vmem:[%s1583_s7] sm:$0xff]  }
  0x26   :  { %466 = vperm.xlu0 %1100, %v462_v20   ;;  %471 = vperm.xlu1 %1101, %v463_v21  }
  0x2a   :  { %454 = vperm.xlu0 %1100, %v450_v22   ;;  %459 = vperm.xlu1 %1101, %v451_v23  }
  0x85   :  { %v82_v25 = vpop.permute.xlu1 %81  ;;  %v72_v26 = vpop.permute.xlu0 %71 }
  0x89   :  { %v87_v30 = vpop.permute.xlu1 %86  ;;  %v77_v33 = vpop.permute.xlu0 %76 }
  0x8d   :  { %v178_v45 = vpop.permute.xlu0 %177  ;;  %v183_v46 = vpop.permute.xlu1 %182 }
  0x91   :  { %v188_v47 = vpop.permute.xlu0 %187  ;;  %v193_v51 = vpop.permute.xlu1 %192 }
  0x95   :  { %v278_v1 = vpop.permute.xlu0 %277  ;;  %v283_v2 = vpop.permute.xlu1 %282 }
  0x99   :  { %v288_v3 = vpop.permute.xlu0 %287  ;;  %v293_v7 = vpop.permute.xlu1 %292 }
  0x9d   :  { %v373_v20 = vpop.permute.xlu1 %372  ;;  %v378_v24 = vpop.permute.xlu0 %377 }
  0xe2   :  { %v1029_v27 = vpop.f32.mrb[0].mxu0 }
  0xe3   :  { %v155_v28 = vadd.f32 %v1029_v27, %v82_v25  ;;  %v146_v29 = vpop.f32.mrb[1].mxu0 }
  0xe4   :  { %v147_v31 = vadd.f32 %v146_v29, %v72_v26  ;;  %v1030_v32 = vpop.f32.mrb[2].mxu0 }
  0xe5   :  { %v158_v34 = vadd.f32 %v1030_v32, %v87_v30  ;;  %v149_v35 = vpop.f32.mrb[3].mxu0  ;;  %v163_v37 = vmax.f32 %v155_v28, 0.0  ;;  %v474_v30 = vld [vmem:[%s1589_s13] sm:$0xff]  ;;  %v983_v32 = vld [vmem:[%s1589_s13 + $0x10] sm:$0xff] }
  0xe6   :  { %v150_v36 = vadd.f32 %v149_v35, %v77_v33  ;;  %v161_v39 = vmax.f32 %v147_v31, 0.0  ;;  %v979_v31 = vld [vmem:[%s1589_s13 + $0x8] sm:$0xff]  ;;  %v987_v33 = vld [vmem:[%s1589_s13 + $0x18] sm:$0xff] }
  0xe7   :  { %v164_v38 = vmax.f32 %v158_v34, 0.0  ;;  %v991_v34 = vld [vmem:[%s1589_s13 + $0x20] sm:$0xff]  ;;  %v995_v35 = vld [vmem:[%s1589_s13 + $0x28] sm:$0xff] }
  0xe8   :  { %v162_v40 = vmax.f32 %v150_v36, 0.0 }
  0xe9   :  { %v166_v41 = vpack.c.bf16 %v164_v38, %v163_v37 }
  0xea   :  { %v165_v42 = vpack.c.bf16 %v162_v40, %v161_v39 }
  0xec   :  { %1031 = vmatprep.subr.bf16.mxu1 %v165_v42 }
  0xed   :  { %1032 = vmatpush3.bf16.msra.mxu1 %v165_v42 }
  0xee   :  { %1033 = vmatprep.subr.bf16.mxu1 %v166_v41 }
  0xf1   :  { %1034 = vmatpush3.bf16.msra.mxu1 %v166_v41 }
  0xf2   :  { %1047 = vmatprep.subr.bf16.mxu1 %v1256_v0 }
  0xf4   :  { %1036 = vmatmul.mubr.msk.bf16.vlgmr.msra.gmra.mrb[0].mxu1 %vm205_vm1, %v1106_v43 }
  0xf5   :  { %1051 = vmatprep.mubr.msk.bf16.mxu1 %vm1257_vm2, %v1256_v0 }
 0x1c7   :  { %v1037_v48 = vpop.f32.mrb[0].mxu1 }
 0x1c8   :  { %v255_v49 = vadd.f32 %v1037_v48, %v188_v47  ;;  %v246_v50 = vpop.f32.mrb[1].mxu1 }
 0x1c9   :  { %v247_v52 = vadd.f32 %v246_v50, %v178_v45  ;;  %v1038_v53 = vpop.f32.mrb[2].mxu1 }
 0x1ca   :  { %v258_v54 = vadd.f32 %v1038_v53, %v193_v51  ;;  %v249_v55 = vpop.f32.mrb[3].mxu1  ;;  %v263_v57 = vmax.f32 %v255_v49, 0.0  ;;  %v1110_v53 = vld [vmem:[%s1585_s9] sm:$0xff]   ;;  %s1258_s9 = smov [#allocation4]  }
 0x1cb   :  { %v250_v56 = vadd.f32 %v249_v55, %v183_v46  ;;  %v261_v59 = vmax.f32 %v247_v52, 0.0  ;;  %s917_s20 = sshll.u32 %s1258_s9, 4  ;;  %s918_s20 = int_to_ptr.vmem [resolvable:$true] %s917_s20 }
 0x1cc   :  { %v264_v58 = vmax.f32 %v258_v54, 0.0  ;;  %s1161_s22 = scalar_lea.vmem %s918_s20, 128  ;;  %p1166_p1 = scmp.lt.s32.totalorder %s918_s20, %s918_s20 }
 0x1cd   :  { %v262_v60 = vmax.f32 %v250_v56, 0.0  ;;  %p1162_p0 = scmp.ne.s32.totalorder %s918_s20, %s1161_s22  ;;  %p1167_p2 = scmp.lt.s32.totalorder %s1161_s22, %s1161_s22 }
 0x1ce   :  { %v266_v61 = vpack.c.bf16 %v264_v58, %v263_v57 }
 0x1cf   :  { %v265_v62 = vpack.c.bf16 %v262_v60, %v261_v59  ;;  %p1168_p3 = por %p1167_p2, %p1166_p1 }
 0x1d1   :  { %1039 = vmatprep.subr.bf16.mxu0 %v265_v62  ;;  %p1169_p4 = pnand %p1168_p3, %p1162_p0 }
 0x1d2   :  { %1040 = vmatpush3.bf16.msra.mxu0 %v265_v62 }
 0x1d3   :  { %1041 = vmatprep.subr.bf16.mxu0 %v266_v61 }
 0x1d6   :  { %1042 = vmatpush3.bf16.msra.mxu0 %v266_v61 }
 0x1d7   :  { %1055 = vmatprep.subr.bf16.mxu0 %v1256_v0 }
 0x1d9   :  { %1044 = vmatmul.mubr.msk.bf16.vlgmr.msra.gmra.mrb[4].mxu0 %vm205_vm1, %v1108_v63 }
 0x1da   :  { %1057 = vmatprep.mubr.msk.bf16.mxu0 %vm1257_vm2, %v1256_v0 }
 0x2ac   :  { %v1045_v4 = vpop.f32.mrb[4].mxu0 }
 0x2ad   :  { %v354_v5 = vadd.f32 %v1045_v4, %v288_v3  ;;  %v345_v6 = vpop.f32.mrb[5].mxu0 }
 0x2ae   :  { %v346_v8 = vadd.f32 %v345_v6, %v278_v1  ;;  %v1046_v9 = vpop.f32.mrb[6].mxu0 }
 0x2af   :  { %v357_v10 = vadd.f32 %v1046_v9, %v293_v7  ;;  %v348_v11 = vpop.f32.mrb[7].mxu0  ;;  %v362_v13 = vmax.f32 %v354_v5, 0.0 }
 0x2b0   :  { %v349_v12 = vadd.f32 %v348_v11, %v283_v2  ;;  %v360_v15 = vmax.f32 %v346_v8, 0.0 }
 0x2b1   :  { %v363_v14 = vmax.f32 %v357_v10, 0.0 }
 0x2b2   :  { %v361_v16 = vmax.f32 %v349_v12, 0.0 }
 0x2b3   :  { %v365_v17 = vpack.c.bf16 %v363_v14, %v362_v13 }
 0x2b4   :  { %v364_v18 = vpack.c.bf16 %v361_v16, %v360_v15 }
 0x2b6   :  { %1048 = vmatpush3.bf16.msra.mxu1 %v364_v18 }
 0x2b7   :  { %1049 = vmatprep.subr.bf16.mxu1 %v1256_v0 }
 0x2ba   :  { %1050 = vmatpush3.bf16.msra.mxu1 %v365_v17 }
 0x2bb   :  { %1061 = vmatprep.subr.bf16.mxu1 %v1256_v0 }
 0x2bd   :  { %1052 = vmatmul.mubr.msk.bf16.vlgmr.msra.gmra.mrb[4].mxu1 %vm205_vm1, %v1109_v19 }
 0x2be   :  { %1063 = vmatprep.mubr.msk.bf16.mxu1 %vm1257_vm2, %v1256_v0 }
 0x390   :  { %v422_v21 = vpop.f32.mrb[4].mxu1 }
 0x391   :  { %v423_v22 = vadd.f32 %v422_v21, %v373_v20  ;;  %v1053_v23 = vpop.f32.mrb[5].mxu1 }
 0x392   :  { %v425_v25 = vpop.f32.mrb[6].mxu1 }
 0x393   :  { %429 = vst [vmem:[#allocation2] sm:$0xff] %v423_v22  ;;  %v426_v26 = vadd.f32 %v425_v25, %v378_v24  ;;  %v1054_v27 = vpop.f32.mrb[7].mxu1 }
 0x395   :  { %v430_v28 = vmul.f32 0.5, %v426_v26 }
 0x397   :  { %v431_v29 = vmul.f32 1.442695, %v430_v28 }
 0x399   :  { %1111 = vpow2.f32 %v431_v29 }
 0x3a3   :  { %v1112_v36 = vpop.eup %1111 }
 0x3a4   :  { %433 = vst [vmem:[#allocation4] sm:$0xff] %v1112_v36  ;;  %v475_v37 = vmul.f32 %v1112_v36, %v474_v30  ;;  %v553_v38 = vmul.f32 %v1112_v36, %v979_v31  ;;  %v623_v39 = vmul.f32 %v1112_v36, %v983_v32  ;;  %v693_v40 = vmul.f32 %v1112_v36, %v987_v33 }
 0x3a5   :  { %v763_v41 = vmul.f32 %v1112_v36, %v991_v34  ;;  %v833_v42 = vmul.f32 %v1112_v36, %v995_v35 }
 0x3a6   :  { %v476_v43 = vadd.f32 %v475_v37, %v423_v22  ;;  %v554_v44 = vadd.f32 %v553_v38, %v423_v22  ;;  %v624_v45 = vadd.f32 %v623_v39, %v423_v22  ;;  %v694_v46 = vadd.f32 %v693_v40, %v423_v22 }
 0x3a7   :  { %v764_v47 = vadd.f32 %v763_v41, %v423_v22  ;;  %v834_v48 = vadd.f32 %v833_v42, %v423_v22 }
 0x3a8   :  { %477 = vst [vmem:[#allocation6] sm:$0xff] %v476_v43  ;;  %v478_v49 = vpack.c.bf16 %v476_v43, %v476_v43  ;;  %556 = vst [vmem:[#allocation6 + $0x8] sm:$0xff] %v554_v44  ;;  %v557_v50 = vpack.c.bf16 %v554_v44, %v554_v44  ;;  %v627_v54 = vpack.c.bf16 %v624_v45, %v624_v45 }
 0x3a9   :  { %626 = vst [vmem:[#allocation6 + $0x10] sm:$0xff] %v624_v45  ;;  %696 = vst [vmem:[#allocation6 + $0x18] sm:$0xff] %v694_v46  ;;  %v697_v55 = vpack.c.bf16 %v694_v46, %v694_v46  ;;  %v767_v58 = vpack.c.bf16 %v764_v47, %v764_v47  ;;  %v837_v59 = vpack.c.bf16 %v834_v48, %v834_v48 }
 0x3aa   :  { %766 = vst [vmem:[#allocation6 + $0x20] sm:$0xff] %v764_v47  ;;  %836 = vst [vmem:[#allocation6 + $0x28] sm:$0xff] %v834_v48  ;;  %v490_v51 = vsel %vm488_vm3, %v478_v49, 0  ;;  %v559_v52 = vsel %vm488_vm3, %v557_v50, 0  ;;  %v629_v56 = vsel %vm488_vm3, %v627_v54, 0 }
 0x3ab   :  { %1056 = vmatpush3.bf16.msra.mxu0 %v490_v51  ;;  %1062 = vmatpush3.bf16.msra.mxu1 %v559_v52  ;;  %v699_v57 = vsel %vm488_vm3, %v697_v55, 0  ;;  %v769_v60 = vsel %vm488_vm3, %v767_v58, 0  ;;  %v839_v61 = vsel %vm488_vm3, %v837_v59, 0 }
 0x3ac   :  { %1067 = vmatprep.subr.bf16.mxu0 %v1256_v0  ;;  %1073 = vmatprep.subr.bf16.mxu1 %v1256_v0 }
 0x3ae   :  { %1058 = vmatmul.mubr.msk.bf16.vlgmr.msra.gmra.mrb[8].mxu0 %vm484_vm4, %v1110_v53  ;;  %1064 = vmatmul.mubr.msk.bf16.vlgmr.msra.gmra.mrb[8].mxu1 %vm484_vm4, %v1110_v53 }
 0x3af   :  { %1068 = vmatpush3.bf16.msra.mxu0 %v629_v56  ;;  %1074 = vmatpush3.bf16.msra.mxu1 %v699_v57 }
 0x3b0   :  { %1069 = vmatprep.mubr.msk.bf16.mxu0 %vm1257_vm2, %v1256_v0  ;;  %1075 = vmatprep.mubr.msk.bf16.mxu1 %vm1257_vm2, %v1256_v0 }
 0x3b1   :  { %1079 = vmatprep.subr.bf16.mxu0 %v1256_v0  ;;  %1085 = vmatprep.subr.bf16.mxu1 %v1256_v0 }
 0x3b6   :  { %1070 = vmatmul.mubr.msk.bf16.vlgmr.msra.gmra.mrb[12].mxu0 %vm484_vm4, %v1110_v53  ;;  %1076 = vmatmul.mubr.msk.bf16.vlgmr.msra.gmra.mrb[12].mxu1 %vm484_vm4, %v1110_v53 }
 0x3b7   :  { %1080 = vmatpush3.bf16.msra.mxu0 %v769_v60  ;;  %1086 = vmatpush3.bf16.msra.mxu1 %v839_v61 }
 0x3b8   :  { %1081 = vmatprep.mubr.msk.bf16.mxu0 %vm1257_vm2, %v1256_v0  ;;  %1087 = vmatprep.mubr.msk.bf16.mxu1 %vm1257_vm2, %v1256_v0 }
 0x3be   :  { %1082 = vmatmul.mubr.msk.bf16.vlgmr.msra.gmra.mrb[16].mxu0 %vm484_vm4, %v1110_v53  ;;  %1088 = vmatmul.mubr.msk.bf16.vlgmr.msra.gmra.mrb[16].mxu1 %vm484_vm4, %v1110_v53 }
 0x3bf   :  { %1172 = shalt.err (!%p1169_p4)
}
 0x3c0   :  { %s1173_s23 = scalar_lea.hbm %s1591_s15, 128 }
 0x3c1   :  { %p1174_p5 = scmp.ne.s32.totalorder %s1591_s15, %s1173_s23  ;;  %p1177_p6 = scmp.lt.u32.totalorder %s1173_s23, %s1591_s15 }
 0x3c3   :  { %p1179_p7 = pnand %p1177_p6, %p1174_p5 }
 0x3c5   :  { %1182 = shalt.err (!%p1179_p7)
}
 0x3c6   :  { %920 = dma.vmem_to_hbm [thread:$0]  %s918_s20, 128, %s1591_s15, [#allocation5]  }
 0x3c7   :  { %s1183_s26 = scalar_lea.vmem %s908_s10, 128  ;;  %p1188_p9 = scmp.lt.s32.totalorder %s908_s10, %s908_s10 }
 0x3c8   :  { %p1184_p8 = scmp.ne.s32.totalorder %s908_s10, %s1183_s26  ;;  %p1189_p10 = scmp.lt.s32.totalorder %s1183_s26, %s1183_s26 }
 0x3ca   :  { %p1190_p11 = por %p1189_p10, %p1188_p9 }
 0x3cc   :  { %p1191_p12 = pnand %p1190_p11, %p1184_p8 }
 0x3ce   :  { %1194 = shalt.err (!%p1191_p12)
}
 0x3cf   :  { %s1195_s29 = scalar_lea.hbm %s1590_s14, 128 }
 0x3d0   :  { %p1196_p13 = scmp.ne.s32.totalorder %s1590_s14, %s1195_s29  ;;  %p1199_p0 = scmp.lt.u32.totalorder %s1195_s29, %s1590_s14 }
 0x3d2   :  { %p1201_p1 = pnand %p1199_p0, %p1196_p13 }
 0x3d4   :  { %1204 = shalt.err (!%p1201_p1)
}
 0x3d5   :  { %910 = dma.vmem_to_hbm [thread:$0]  %s908_s10, 128, %s1590_s14, [#allocation3]  }
 0x3d6   :  { %s1260_s19 = smov [#allocation6]  }
 0x3d7   :  { %s926_s8 = sshll.u32 %s1260_s19, 4  ;;  %s927_s8 = int_to_ptr.vmem [resolvable:$true] %s926_s8 }
 0x3d8   :  { %s1205_s13 = scalar_lea.vmem %s927_s8, 768  ;;  %p1210_p3 = scmp.lt.s32.totalorder %s927_s8, %s927_s8 }
 0x3d9   :  { %p1206_p2 = scmp.ne.s32.totalorder %s927_s8, %s1205_s13  ;;  %p1211_p4 = scmp.lt.s32.totalorder %s1205_s13, %s1205_s13 }
 0x3db   :  { %p1212_p5 = por %p1211_p4, %p1210_p3 }
 0x3dd   :  { %p1213_p6 = pnand %p1212_p5, %p1206_p2 }
 0x3df   :  { %1216 = shalt.err (!%p1213_p6)
}
 0x3e0   :  { %s1217_s20 = scalar_lea.hbm %s1592_s16, 768 }
 0x3e1   :  { %p1218_p7 = scmp.ne.s32.totalorder %s1592_s16, %s1217_s20  ;;  %p1221_p8 = scmp.lt.u32.totalorder %s1217_s20, %s1592_s16 }
 0x3e3   :  { %p1223_p9 = pnand %p1221_p8, %p1218_p7 }
 0x3e5   :  { %1226 = shalt.err (!%p1223_p9)
}
 0x3e6   :  { %s1261_s10 = smov 128   ;;  %s1262_s12 = smov 8   ;;  %v443_v62 = vpop.permute.xlu0 %442  ;;  %v1537_v63 = vpop.permute.xlu1 %447 }
 0x3e7   :  { %932 = dma.vmem_to_hbm [thread:$0]  %s927_s8, 768, %s1592_s16, [#allocation5], %s1261_s10, %s1261_s10, %s1262_s12  }
 0x3e8   :  { %s1263_s16 = smov [#allocation7]  }
 0x3e9   :  { %s938_s3 = sshll.u32 %s1263_s16, 4  ;;  %s939_s3 = int_to_ptr.vmem [resolvable:$true] %s938_s3 }
 0x3ea   :  { %v1545_v58 = vpop.permute.xlu0 %466  ;;  %s1227_s4 = scalar_lea.vmem %s939_s3, 1536  ;;  %p1232_p11 = scmp.lt.s32.totalorder %s939_s3, %s939_s3 }
 0x3eb   :  { %p1228_p10 = scmp.ne.s32.totalorder %s939_s3, %s1227_s4  ;;  %p1233_p12 = scmp.lt.s32.totalorder %s1227_s4, %s1227_s4 }
 0x3ed   :  { %p1234_p13 = por %p1233_p12, %p1232_p11 }
 0x3ef   :  { %p1235_p0 = pnand %p1234_p13, %p1228_p10 }
 0x481   :  { %v526_v0 = vpop.f32.mrb[8].mxu0  ;;  %v595_v1 = vpop.f32.mrb[8].mxu1 }
 0x482   :  { %v527_v2 = vadd.f32 %v526_v0, %v443_v62  ;;  %v596_v3 = vadd.f32 %v595_v1, %v443_v62  ;;  %v1059_v4 = vpop.f32.mrb[9].mxu0  ;;  %v1065_v5 = vpop.f32.mrb[9].mxu1 }
 0x483   :  { %v529_v6 = vpop.f32.mrb[10].mxu0  ;;  %v598_v7 = vpop.f32.mrb[10].mxu1 }
 0x484   :  { %v977_v8 = vmul.f32 -1.442695, %v527_v2  ;;  %v981_v9 = vmul.f32 -1.442695, %v596_v3  ;;  %v530_v10 = vadd.f32 %v529_v6, %v1537_v63  ;;  %v599_v11 = vadd.f32 %v598_v7, %v1537_v63  ;;  %v1060_v12 = vpop.f32.mrb[11].mxu0  ;;  %v1066_v13 = vpop.f32.mrb[11].mxu1 }
 0x485   :  { %v1547_v0 = vpop.permute.xlu1 %471  ;;  %v455_v6 = vpop.permute.xlu0 %454 }
 0x486   :  { %1113 = vpow2.f32 %v977_v8  ;;  %v978_v14 = vmul.f32 -1.442695, %v530_v10  ;;  %v982_v15 = vmul.f32 -1.442695, %v599_v11 }
 0x487   :  { %1115 = vpow2.f32 %v981_v9 }
 0x488   :  { %1117 = vpow2.f32 %v978_v14 }
 0x489   :  { %1119 = vpow2.f32 %v982_v15  ;;  %v665_v16 = vpop.f32.mrb[12].mxu0  ;;  %v735_v17 = vpop.f32.mrb[12].mxu1 }
 0x48a   :  { %v666_v18 = vadd.f32 %v665_v16, %v443_v62  ;;  %v736_v19 = vadd.f32 %v735_v17, %v443_v62  ;;  %v1071_v20 = vpop.f32.mrb[13].mxu0  ;;  %v1077_v21 = vpop.f32.mrb[13].mxu1 }
 0x48b   :  { %v668_v22 = vpop.f32.mrb[14].mxu0  ;;  %v738_v23 = vpop.f32.mrb[14].mxu1 }
 0x48c   :  { %v985_v24 = vmul.f32 -1.442695, %v666_v18  ;;  %v989_v25 = vmul.f32 -1.442695, %v736_v19  ;;  %v669_v26 = vadd.f32 %v668_v22, %v1537_v63  ;;  %v739_v27 = vadd.f32 %v738_v23, %v1537_v63  ;;  %v1072_v28 = vpop.f32.mrb[15].mxu0  ;;  %v1078_v29 = vpop.f32.mrb[15].mxu1 }
 0x48d   :  { %v460_v12 = vpop.permute.xlu1 %459 }
 0x48e   :  { %1121 = vpow2.f32 %v985_v24  ;;  %v986_v30 = vmul.f32 -1.442695, %v669_v26  ;;  %v990_v31 = vmul.f32 -1.442695, %v739_v27 }
 0x48f   :  { %1123 = vpow2.f32 %v989_v25 }
 0x490   :  { %v1114_v32 = vpop.eup %1113  ;;  %1125 = vpow2.f32 %v986_v30 }
 0x491   :  { %v1116_v33 = vpop.eup %1115  ;;  %v539_v34 = vadd.f32 1.0, %v1114_v32  ;;  %1127 = vpow2.f32 %v990_v31  ;;  %v805_v35 = vpop.f32.mrb[16].mxu0 }
 0x492   :  { %v875_v36 = vpop.f32.mrb[16].mxu1  ;;  %v1118_v37 = vpop.eup %1117  ;;  %v608_v38 = vadd.f32 1.0, %v1116_v33  ;;  %v806_v39 = vadd.f32 %v805_v35, %v443_v62 }
 0x493   :  { %v876_v40 = vadd.f32 %v875_v36, %v443_v62  ;;  %v1083_v41 = vpop.f32.mrb[17].mxu0  ;;  %v1089_v42 = vpop.f32.mrb[17].mxu1  ;;  %1129 = vrcp.f32 %v539_v34  ;;  %v540_v44 = vadd.f32 1.0, %v1118_v37 }
 0x494   :  { %v1120_v43 = vpop.eup %1119  ;;  %v808_v45 = vpop.f32.mrb[18].mxu0  ;;  %1131 = vrcp.f32 %v608_v38  ;;  %v993_v48 = vmul.f32 -1.442695, %v806_v39 }
 0x495   :  { %v878_v46 = vpop.f32.mrb[18].mxu1  ;;  %v609_v47 = vadd.f32 1.0, %v1120_v43  ;;  %v997_v49 = vmul.f32 -1.442695, %v876_v40  ;;  %v1084_v50 = vpop.f32.mrb[19].mxu0  ;;  %1133 = vrcp.f32 %v540_v44  ;;  %v809_v51 = vadd.f32 %v808_v45, %v1537_v63 }
 0x496   :  { %v879_v52 = vadd.f32 %v878_v46, %v1537_v63  ;;  %v1090_v53 = vpop.f32.mrb[19].mxu1 }
 0x497   :  { %1135 = vrcp.f32 %v609_v47  ;;  %v994_v54 = vmul.f32 -1.442695, %v809_v51 }
 0x498   :  { %1137 = vpow2.f32 %v993_v48  ;;  %v998_v55 = vmul.f32 -1.442695, %v879_v52  ;;  %v1122_v56 = vpop.eup %1121 }
 0x499   :  { %1139 = vpow2.f32 %v997_v49  ;;  %v1124_v57 = vpop.eup %1123  ;;  %v678_v59 = vadd.f32 1.0, %v1122_v56 }
 0x49a   :  { %1141 = vpow2.f32 %v994_v54  ;;  %v1126_v60 = vpop.eup %1125  ;;  %v748_v61 = vadd.f32 1.0, %v1124_v57 }
 0x49b   :  { %1143 = vpow2.f32 %v998_v55  ;;  %v1128_v62 = vpop.eup %1127  ;;  %v679_v63 = vadd.f32 1.0, %v1126_v60 }
 0x49c   :  { %1145 = vrcp.f32 %v678_v59  ;;  %v749_v1 = vadd.f32 1.0, %v1128_v62 }
 0x49d   :  { %1147 = vrcp.f32 %v748_v61  ;;  %v1130_v2 = vpop.eup %1129 }
 0x49e   :  { %1149 = vrcp.f32 %v679_v63  ;;  %v1132_v3 = vpop.eup %1131  ;;  %v545_v4 = vmul.f32 %v1130_v2, %v1545_v58 }
 0x49f   :  { %1151 = vrcp.f32 %v749_v1  ;;  %v1134_v5 = vpop.eup %1133  ;;  %v614_v7 = vmul.f32 %v1132_v3, %v1545_v58 }
 0x4a0   :  { %v547_v9 = vadd.f32 %v545_v4, %v455_v6  ;;  %v546_v10 = vmul.f32 %v1134_v5, %v1547_v0 }
 0x4a1   :  { %v1136_v8 = vpop.eup %1135  ;;  %v616_v13 = vadd.f32 %v614_v7, %v455_v6 }
 0x4a2   :  { %v1138_v11 = vpop.eup %1137  ;;  %v615_v14 = vmul.f32 %v1136_v8, %v1547_v0  ;;  %549 = vst [vmem:[#allocation7] sm:$0xff] %v547_v9  ;;  %v548_v16 = vadd.f32 %v546_v10, %v460_v12 }
 0x4a3   :  { %v1140_v15 = vpop.eup %1139  ;;  %v818_v17 = vadd.f32 1.0, %v1138_v11  ;;  %619 = vst [vmem:[#allocation7 + $0x10] sm:$0xff] %v616_v13 }
 0x4a4   :  { %v1142_v18 = vpop.eup %1141  ;;  %v617_v19 = vadd.f32 %v615_v14, %v460_v12  ;;  %v888_v20 = vadd.f32 1.0, %v1140_v15  ;;  %550 = vst [vmem:[#allocation7 + $0x8] sm:$0xff] %v548_v16 }
 0x4a5   :  { %v1144_v21 = vpop.eup %1143  ;;  %1153 = vrcp.f32 %v818_v17  ;;  %v819_v22 = vadd.f32 1.0, %v1142_v18 }
 0x4a6   :  { %v1146_v23 = vpop.eup %1145  ;;  %620 = vst [vmem:[#allocation7 + $0x18] sm:$0xff] %v617_v19  ;;  %1155 = vrcp.f32 %v888_v20  ;;  %v889_v24 = vadd.f32 1.0, %v1144_v21 }
 0x4a7   :  { %v1148_v25 = vpop.eup %1147  ;;  %v684_v26 = vmul.f32 %v1146_v23, %v1545_v58  ;;  %1157 = vrcp.f32 %v819_v22 }
 0x4a8   :  { %v1150_v27 = vpop.eup %1149  ;;  %v754_v28 = vmul.f32 %v1148_v25, %v1545_v58  ;;  %1159 = vrcp.f32 %v889_v24 }
 0x4a9   :  { %v1152_v29 = vpop.eup %1151  ;;  %v686_v30 = vadd.f32 %v684_v26, %v455_v6  ;;  %v685_v31 = vmul.f32 %v1150_v27, %v1547_v0 }
 0x4aa   :  { %v756_v32 = vadd.f32 %v754_v28, %v455_v6  ;;  %v755_v33 = vmul.f32 %v1152_v29, %v1547_v0 }
 0x4ab   :  { %689 = vst [vmem:[#allocation7 + $0x20] sm:$0xff] %v686_v30  ;;  %v687_v34 = vadd.f32 %v685_v31, %v460_v12 }
 0x4ac   :  { %759 = vst [vmem:[#allocation7 + $0x30] sm:$0xff] %v756_v32  ;;  %v757_v35 = vadd.f32 %v755_v33, %v460_v12 }
 0x4ad   :  { %690 = vst [vmem:[#allocation7 + $0x28] sm:$0xff] %v687_v34 }
 0x4ae   :  { %760 = vst [vmem:[#allocation7 + $0x38] sm:$0xff] %v757_v35 }
 0x4af   :  { %v1154_v36 = vpop.eup %1153 }
 0x4b0   :  { %v1156_v37 = vpop.eup %1155  ;;  %v824_v38 = vmul.f32 %v1154_v36, %v1545_v58 }
 0x4b1   :  { %v1158_v39 = vpop.eup %1157  ;;  %v894_v40 = vmul.f32 %v1156_v37, %v1545_v58 }
 0x4b2   :  { %v1160_v41 = vpop.eup %1159  ;;  %v826_v42 = vadd.f32 %v824_v38, %v455_v6  ;;  %v825_v43 = vmul.f32 %v1158_v39, %v1547_v0 }
 0x4b3   :  { %v896_v44 = vadd.f32 %v894_v40, %v455_v6  ;;  %v895_v45 = vmul.f32 %v1160_v41, %v1547_v0 }
 0x4b4   :  { %829 = vst [vmem:[#allocation7 + $0x40] sm:$0xff] %v826_v42  ;;  %v827_v46 = vadd.f32 %v825_v43, %v460_v12 }
 0x4b5   :  { %899 = vst [vmem:[#allocation7 + $0x50] sm:$0xff] %v896_v44  ;;  %v897_v47 = vadd.f32 %v895_v45, %v460_v12 }
 0x4b6   :  { %830 = vst [vmem:[#allocation7 + $0x48] sm:$0xff] %v827_v46 }
 0x4b7   :  { %900 = vst [vmem:[#allocation7 + $0x58] sm:$0xff] %v897_v47 }
 0x4b8   :  { %1238 = shalt.err (!%p1235_p0)
}
 0x4b9   :  { %s1239_s7 = scalar_lea.hbm %s1593_s17, 1536 }
 0x4ba   :  { %p1240_p1 = scmp.ne.s32.totalorder %s1593_s17, %s1239_s7  ;;  %p1243_p2 = scmp.lt.u32.totalorder %s1239_s7, %s1593_s17 }
 0x4bc   :  { %p1245_p3 = pnand %p1243_p2, %p1240_p1 }
 0x4be   :  { %1248 = shalt.err (!%p1245_p3)
}
 0x4bf   :  { %944 = dma.vmem_to_hbm [thread:$0]  %s939_s3, 1536, %s1593_s17, [#allocation8], %s1261_s10, %s1261_s10, %s1262_s12  }
 0x4c0   :  { %1249 = dma.done.wait [#allocation3], 128  }
 0x4c1   :  { %1250 = vsyncadd [#allocation3], 4294967168 }
 0x4c2   :  { %1251 = dma.done.wait [#allocation5], 896  }
 0x4c3   :  { %1252 = vsyncadd [#allocation5], 4294966400 }
 0x4c4   :  { %1253 = dma.done.wait [#allocation8], 1536  }
 0x4c5   :  { %1254 = vsyncadd [#allocation8], 4294965760 }
 0x4c6   :  { %957 = vsyncpa [#allocation3], 1 }
 0x4c7   :  { %958 = vsyncpa [#allocation5], 1 }
 0x4c8   :  { %959 = vsyncpa [#allocation8], 1 }

</bundles_post_ra>
